<compile_context>
chip_gen: v5e
topology: v5e:2x2
jax: 0.10.0
libtpu: 0.0.40
codegen_flags: <defaults>
</compile_context>

<pallas_src>
import jax
import jax.numpy as jnp
from jax import lax
from jax.experimental import pallas as pl
from jax.experimental.pallas import tpu as pltpu

EPS = 1e-5


# ------------------------------ VMEM budgeting --------------------------------
def _default_vmem_limit():
    """Per-TensorCore VMEM budget: 3/4 of physical, capped at 100 MiB.

    v7x (64 MiB/TC) -> 48 MiB; v5e/v6e (128 MiB) -> 96 MiB.  Falls back to 48 MiB."""
    try:
        cap = int(pltpu.get_tpu_info().vmem_capacity_bytes)
        return min((cap * 3) // 4, 100 * 1024 * 1024)
    except Exception:
        return 48 * 1024 * 1024


_VMEM_LIMIT = _default_vmem_limit()
_TILE_BUDGET = _VMEM_LIMIT // 2  # bytes of blocks per grid step (per TC); rest = compiler slack

_COMPILER_PARAMS = pltpu.CompilerParams(
    dimension_semantics=("parallel",),  # independent pixel tiles -> megacore-shardable on v7x
    vmem_limit_bytes=_VMEM_LIMIT,
)


def _pick_conv_tile(p, k_rows, cout, budget):
    """Largest lane-dense pixel-tile width TP such that the conv kernel's blocks fit:
    double-buffered bf16 patches/(Cout,TP) output + f32 affine temp + 2x bf16 weight."""
    per_lane = 2 * (2 * k_rows + 2 * cout) + 4 * k_rows  # dbl-buf bf16 I/O + f32 affine temp
    fixed = 2 * 2 * cout * k_rows                        # dbl-buffered bf16 weight (const index)
    for min_steps in (2, 1):                             # prefer >=2 steps (pipelining/megacore)
        for tp in (4096, 2048, 1024, 512, 256, 128):
            if p % tp == 0 and p // tp >= min_steps and tp * per_lane + fixed <= budget:
                return tp
    return p  # tiny/odd problem: a single full-extent tile is also a legal block


def _pick_ew_tile(p, c, budget):
    """Wide lane-dense tile for the pure-elementwise (HBM-roofline) kernel,
    independent of the matmul tile: y2(bf16) + x(f32) + out(f32), double-buffered."""
    per_lane = 2 * c * (2 + 4 + 4)
    for min_steps in (2, 1):
        for tp in (32768, 16384, 8192, 4096, 2048, 1024, 512, 256, 128):
            if p % tp == 0 and p // tp >= min_steps and tp * per_lane <= budget:
                return tp
    return p


# ---------------------------------- kernels ----------------------------------
def conv_stats_kernel(p_ref, w_ref, y_ref, sum_ref, sq_ref):
    """conv1: one im2col matmul per pixel tile + per-tile partial BN statistics.

    p_ref   : (9*Cin, TP)   bf16 im2col patches tile (lane-dense)
    w_ref   : (Cout, 9*Cin) bf16 reshaped conv weight (whole, constant index map)
    y_ref   : (Cout, TP)    bf16 raw conv output tile
    sum_ref : (1, Cout, 1)  f32 per-tile partial sum
    sq_ref  : (1, Cout, 1)  f32 per-tile partial sum of squares
    """
    y = jnp.dot(w_ref[...], p_ref[...], preferred_element_type=jnp.float32)
    y_ref[...] = y.astype(y_ref.dtype)
    cout = y.shape[0]
    sum_ref[...] = jnp.sum(y, axis=1, keepdims=True).reshape(1, cout, 1)
    sq_ref[...] = jnp.sum(y * y, axis=1, keepdims=True).reshape(1, cout, 1)


def affine_relu_conv_stats_kernel(p_ref, w_ref, sc_ref, sh_ref, y_ref, sum_ref, sq_ref):
    """conv2: bn1 affine + ReLU fused onto the (tap-replicated) patch rows, then the
    im2col matmul + per-tile partial BN statistics.  Exact: per-channel affine + ReLU
    commute with patch extraction.

    sc_ref / sh_ref : (9*Cin, 1) f32, bn1 scale/shift replicated per tap in the same
                      (kh, kw, cin) row order used by the wrapper im2col.
    """
    h = jnp.maximum(p_ref[...].astype(jnp.float32) * sc_ref[...] + sh_ref[...], 0.0)
    y = jnp.dot(w_ref[...], h.astype(jnp.bfloat16), preferred_element_type=jnp.float32)
    y_ref[...] = y.astype(y_ref.dtype)
    cout = y.shape[0]
    sum_ref[...] = jnp.sum(y, axis=1, keepdims=True).reshape(1, cout, 1)
    sq_ref[...] = jnp.sum(y * y, axis=1, keepdims=True).reshape(1, cout, 1)


def bn_add_relu_kernel(y_ref, x_ref, sc_ref, sh_ref, o_ref):
    """Fused bn2 affine + identity residual add + ReLU (lane-dense, HBM-roofline)."""
    z = y_ref[...].astype(jnp.float32) * sc_ref[...] + sh_ref[...] + x_ref[...]
    o_ref[...] = jnp.maximum(z, 0.0).astype(o_ref.dtype)


# ---------------------------------- wrapper -----------------------------------
def _im2col_3x3(x_cnhw):
    """(C, N, H, W) -> (9*C, N*H*W) patches; row index = (kh*3+kw)*C + c (zero-padded)."""
    c, n, h, w = x_cnhw.shape
    xp = jnp.pad(x_cnhw, ((0, 0), (0, 0), (1, 1), (1, 1)))
    taps = [xp[:, :, kh:kh + h, kw:kw + w] for kh in range(3) for kw in range(3)]
    return jnp.concatenate(taps, axis=0).reshape(9 * c, n * h * w)


def _conv_bn_stats(patches, wmat, scale_shift, p, tp):
    """Gridded conv (one matmul per pixel tile), optionally fused with a per-row
    affine + ReLU on the patches; returns bf16 conv output + f32 batch sum/sumsq."""
    cout, k = wmat.shape
    n_tiles = p // tp
    if scale_shift is None:
        kernel = conv_stats_kernel
        extra_inputs = ()
        extra_specs = []
    else:
        kernel = affine_relu_conv_stats_kernel
        extra_inputs = scale_shift                       # (sc, sh), each (9*Cin, 1) f32
        extra_specs = [pl.BlockSpec((k, 1), lambda i: (0, 0)),
                       pl.BlockSpec((k, 1), lambda i: (0, 0))]

    y, sums, sqs = pl.pallas_call(
        kernel,
        grid=(n_tiles,),
        in_specs=[
            pl.BlockSpec((k, tp), lambda i: (0, i)),     # bf16 patches tile
            pl.BlockSpec((cout, k), lambda i: (0, 0)),   # bf16 weight (constant index map)
            *extra_specs,
        ],
        out_specs=[
            pl.BlockSpec((cout, tp), lambda i: (0, i)),
            pl.BlockSpec((1, cout, 1), lambda i: (i, 0, 0)),
            pl.BlockSpec((1, cout, 1), lambda i: (i, 0, 0)),
        ],
        out_shape=[
            jax.ShapeDtypeStruct((cout, p), jnp.bfloat16),
            jax.ShapeDtypeStruct((n_tiles, cout, 1), jnp.float32),
            jax.ShapeDtypeStruct((n_tiles, cout, 1), jnp.float32),
        ],
        compiler_params=_COMPILER_PARAMS,
    )(patches, wmat, *extra_inputs)

    total = jnp.sum(sums, axis=0)[:, 0]     # (Cout,)
    total_sq = jnp.sum(sqs, axis=0)[:, 0]   # (Cout,)
    return y, total, total_sq


def _bn_scale_shift(total, total_sq, count, gamma, beta):
    """Fold training-mode BN into a per-channel scale/shift (O(C) work).
    Variance is clamped at 0 so f32 cancellation in E[x^2]-E[x]^2 can never NaN rsqrt."""
    mean = total / count
    var = jnp.maximum(total_sq / count - mean * mean, 0.0)  # biased var (PyTorch training norm)
    scale = gamma * lax.rsqrt(var + EPS)
    shift = beta - mean * scale
    return scale.reshape(-1, 1), shift.reshape(-1, 1)


@jax.jit
def residual_block(x_nchw, w1, g1, b1, w2, g2, b2):
    """x_nchw: (N, C, H, W) f32. w1/w2: HWIO (3,3,C,C). g*/b*: (C,). Returns NCHW f32."""
    n, c, h, w = x_nchw.shape
    cout = w1.shape[-1]
    assert w1.shape[2] == c and w2.shape[2] == cout and w2.shape[-1] == cout
    assert cout == c, "identity skip requires in_channels == out_channels (downsample=None)"
    p = n * h * w

    tp1 = _pick_conv_tile(p, 9 * c, cout, _TILE_BUDGET)
    tp2 = _pick_conv_tile(p, 9 * cout, cout, _TILE_BUDGET)
    tpe = _pick_ew_tile(p, cout, _TILE_BUDGET)

    # channels-on-sublanes / pixels-on-lanes 2D view (single relayout, done once in XLA)
    x_cnhw = jnp.transpose(x_nchw, (1, 0, 2, 3)).astype(jnp.float32)
    x2d = x_cnhw.reshape(c, p)                                # f32 for the exact residual add

    # conv weights -> (Cout, 9*Cin) bf16, matching the (kh, kw, cin) patch row order
    w1m = jnp.transpose(w1, (3, 0, 1, 2)).reshape(cout, 9 * c).astype(jnp.bfloat16)
    w2m = jnp.transpose(w2, (3, 0, 1, 2)).reshape(cout, 9 * cout).astype(jnp.bfloat16)

    # ---- conv1 (one im2col matmul per tile) + BN1 batch statistics ----
    patches1 = _im2col_3x3(x_cnhw.astype(jnp.bfloat16))       # bf16 patches (stopgap im2col)
    y1, s1, q1 = _conv_bn_stats(patches1, w1m, None, p, tp1)  # y1: (C, P) bf16
    scale1, shift1 = _bn_scale_shift(s1, q1, p, g1, b1)

    # ---- conv2, with bn1 affine + ReLU fused onto the patch rows (h1 never hits HBM) ----
    patches2 = _im2col_3x3(y1.reshape(cout, n, h, w))         # bf16 patches of *raw* y1
    sc1 = jnp.tile(scale1, (9, 1))                            # tap-major, channel-minor order
    sh1 = jnp.tile(shift1, (9, 1))
    y2, s2, q2 = _conv_bn_stats(patches2, w2m, (sc1, sh1), p, tp2)
    scale2, shift2 = _bn_scale_shift(s2, q2, p, g2, b2)

    # ---- fused bn2 affine + identity residual add + relu (wide lane-dense tiles) ----
    out2d = pl.pallas_call(
        bn_add_relu_kernel,
        grid=(p // tpe,),
        in_specs=[
            pl.BlockSpec((cout, tpe), lambda i: (0, i)),
            pl.BlockSpec((c, tpe), lambda i: (0, i)),
            pl.BlockSpec((cout, 1), lambda i: (0, 0)),
            pl.BlockSpec((cout, 1), lambda i: (0, 0)),
        ],
        out_specs=pl.BlockSpec((cout, tpe), lambda i: (0, i)),
        out_shape=jax.ShapeDtypeStruct((cout, p), jnp.float32),
        compiler_params=_COMPILER_PARAMS,
    )(y2, x2d, scale2, shift2)

    return jnp.transpose(out2d.reshape(cout, n, h, w), (1, 0, 2, 3)).astype(x_nchw.dtype)


# ------------------------- pure-JAX reference (verification) -------------------------
def _conv3x3_nhwc(x, w):
    return lax.conv_general_dilated(
        x, w, window_strides=(1, 1), padding=((1, 1), (1, 1)),
        dimension_numbers=("NHWC", "HWIO", "NHWC"))


def residual_block_ref(x_nchw, w1, g1, b1, w2, g2, b2):
    x = jnp.transpose(x_nchw, (0, 2, 3, 1)).astype(jnp.float32)

    def bn(y, g, b):
        m = jnp.mean(y, axis=(0, 1, 2), keepdims=True)
        v = jnp.mean((y - m) ** 2, axis=(0, 1, 2), keepdims=True)
        return (y - m) * lax.rsqrt(v + EPS) * g + b

    hh = jax.nn.relu(bn(_conv3x3_nhwc(x, w1), g1, b1))
    z = bn(_conv3x3_nhwc(hh, w2), g2, b2)
    z = jax.nn.relu(z + x)
    return jnp.transpose(z, (0, 3, 1, 2)).astype(x_nchw.dtype)


if __name__ == "__main__":
    # Small deterministic config: N=2, in_channels=out_channels=8, 16x16 spatial.
    N, C, H, W = 2, 8, 16, 16
    key = jax.random.PRNGKey(0)
    kx, kw1, kw2 = jax.random.split(key, 3)

    x = jax.random.normal(kx, (N, C, H, W), jnp.float32)

    fan_in = C * 3 * 3
    w1 = jax.random.normal(kw1, (3, 3, C, C), jnp.float32) * (2.0 / fan_in) ** 0.5
    w2 = jax.random.normal(kw2, (3, 3, C, C), jnp.float32) * (2.0 / fan_in) ** 0.5
    g1 = jnp.ones((C,), jnp.float32)
    b1 = jnp.zeros((C,), jnp.float32)
    g2 = jnp.ones((C,), jnp.float32)
    b2 = jnp.zeros((C,), jnp.float32)

    out = residual_block(x, w1, g1, b1, w2, g2, b2)
    out = jax.block_until_ready(out)

    ref = residual_block_ref(x, w1, g1, b1, w2, g2, b2)
    assert out.shape == (N, C, H, W)
    # bf16 MXU operands + bf16 intermediates => looser tolerance than a pure-f32 check.
    assert jnp.allclose(out, ref, atol=5e-2, rtol=5e-2), "mismatch vs JAX reference"

    print("KERNEL_OK")
</pallas_src>

<mosaic_0001>
module attributes {stable_mosaic.version = 11 : i64} {
  func.func @conv_stats_kernel(%arg0: i32, %arg1: memref<72x256xbf16, #tpu.memory_space<vmem>>, %arg2: memref<8x72xbf16, #tpu.memory_space<vmem>>, %arg3: memref<8x256xbf16, #tpu.memory_space<vmem>>, %arg4: memref<1x8x1xf32, #tpu.memory_space<vmem>>, %arg5: memref<1x8x1xf32, #tpu.memory_space<vmem>>) attributes {dimension_semantics = [#tpu.dimension_semantics<parallel>], iteration_bounds = array<i64: 2>, scalar_prefetch = 0 : i64, scratch_operands = 0 : i64, tpu.core_type = #tpu.core_type<tc>, window_params = [{transform_indices = @transform_0, window_bounds = array<i64: 72, 256>}, {pipeline_mode = #tpu.pipeline_mode<synchronous>, transform_indices = @transform_1, window_bounds = array<i64: 8, 72>}, {transform_indices = @transform_2, window_bounds = array<i64: 8, 256>}, {transform_indices = @transform_3, window_bounds = array<i64: 1, 8, 1>}, {transform_indices = @transform_4, window_bounds = array<i64: 1, 8, 1>}]} {
    %c0 = arith.constant 0 : index
    %c0_0 = arith.constant 0 : index
    %0 = vector.load %arg2[%c0, %c0_0] : memref<8x72xbf16, #tpu.memory_space<vmem>>, vector<8x72xbf16>
    %c0_1 = arith.constant 0 : index
    %c0_2 = arith.constant 0 : index
    %1 = vector.load %arg1[%c0_1, %c0_2] : memref<72x256xbf16, #tpu.memory_space<vmem>>, vector<72x256xbf16>
    %cst = arith.constant dense<0.000000e+00> : vector<8x256xf32>
    %2 = tpu.matmul %0, %1, %cst {dimension_numbers = #tpu.dot_dimension_numbers<[1], [0], [0], [1], [0, 0, 1, 1], [], []>} : vector<8x72xbf16>, vector<72x256xbf16>, vector<8x256xf32> -> vector<8x256xf32>
    %3 = arith.truncf %2 : vector<8x256xf32> to vector<8x256xbf16>
    %c0_3 = arith.constant 0 : index
    %c0_4 = arith.constant 0 : index
    %4 = vector.load %arg3[%c0_3, %c0_4] : memref<8x256xbf16, #tpu.memory_space<vmem>>, vector<8x256xbf16>
    tpu.vector_store %arg3[%c0_3, %c0_4], %3 {strides = array<i32>} : memref<8x256xbf16, #tpu.memory_space<vmem>>, vector<8x256xbf16>,
    %cst_5 = arith.constant dense<0.000000e+00> : vector<8xf32>
    %5 = vector.multi_reduction <add>, %2, %cst_5 [1] : vector<8x256xf32> to vector<8xf32>
    %6 = vector.shape_cast %5 : vector<8xf32> to vector<8x1xf32>
    %7 = vector.shape_cast %6 : vector<8x1xf32> to vector<1x8x1xf32>
    %c0_6 = arith.constant 0 : index
    %c0_7 = arith.constant 0 : index
    %c0_8 = arith.constant 0 : index
    %8 = vector.load %arg4[%c0_6, %c0_7, %c0_8] : memref<1x8x1xf32, #tpu.memory_space<vmem>>, vector<1x8x1xf32>
    tpu.vector_store %arg4[%c0_6, %c0_7, %c0_8], %7 {strides = array<i32>} : memref<1x8x1xf32, #tpu.memory_space<vmem>>, vector<1x8x1xf32>,
    %9 = arith.mulf %2, %2 : vector<8x256xf32>
    %cst_9 = arith.constant dense<0.000000e+00> : vector<8xf32>
    %10 = vector.multi_reduction <add>, %9, %cst_9 [1] : vector<8x256xf32> to vector<8xf32>
    %11 = vector.shape_cast %10 : vector<8xf32> to vector<8x1xf32>
    %12 = vector.shape_cast %11 : vector<8x1xf32> to vector<1x8x1xf32>
    %c0_10 = arith.constant 0 : index
    %c0_11 = arith.constant 0 : index
    %c0_12 = arith.constant 0 : index
    %13 = vector.load %arg5[%c0_10, %c0_11, %c0_12] : memref<1x8x1xf32, #tpu.memory_space<vmem>>, vector<1x8x1xf32>
    tpu.vector_store %arg5[%c0_10, %c0_11, %c0_12], %12 {strides = array<i32>} : memref<1x8x1xf32, #tpu.memory_space<vmem>>, vector<1x8x1xf32>,
    return
  }
  func.func @transform_0(%arg0: i32) -> (i32, i32) {
    %c0_i32 = arith.constant 0 : i32
    %c0_i32_0 = arith.constant 0 : i32
    return %c0_i32, %arg0 : i32, i32
  }
  func.func @transform_1(%arg0: i32) -> (i32, i32) {
    %c0_i32 = arith.constant 0 : i32
    %c0_i32_0 = arith.constant 0 : i32
    %c0_i32_1 = arith.constant 0 : i32
    return %c0_i32, %c0_i32_0 : i32, i32
  }
  func.func @transform_2(%arg0: i32) -> (i32, i32) {
    %c0_i32 = arith.constant 0 : i32
    %c0_i32_0 = arith.constant 0 : i32
    return %c0_i32, %arg0 : i32, i32
  }
  func.func @transform_3(%arg0: i32) -> (i32, i32, i32) {
    %c0_i32 = arith.constant 0 : i32
    %c0_i32_0 = arith.constant 0 : i32
    %c0_i32_1 = arith.constant 0 : i32
    return %arg0, %c0_i32, %c0_i32_0 : i32, i32, i32
  }
  func.func @transform_4(%arg0: i32) -> (i32, i32, i32) {
    %c0_i32 = arith.constant 0 : i32
    %c0_i32_0 = arith.constant 0 : i32
    %c0_i32_1 = arith.constant 0 : i32
    return %arg0, %c0_i32, %c0_i32_0 : i32, i32, i32
  }
}

module attributes {stable_mosaic.version = 11 : i64} {
  func.func @affine_relu_conv_stats_kernel(%arg0: i32, %arg1: memref<72x256xbf16, #tpu.memory_space<vmem>>, %arg2: memref<8x72xbf16, #tpu.memory_space<vmem>>, %arg3: memref<72x1xf32, #tpu.memory_space<vmem>>, %arg4: memref<72x1xf32, #tpu.memory_space<vmem>>, %arg5: memref<8x256xbf16, #tpu.memory_space<vmem>>, %arg6: memref<1x8x1xf32, #tpu.memory_space<vmem>>, %arg7: memref<1x8x1xf32, #tpu.memory_space<vmem>>) attributes {dimension_semantics = [#tpu.dimension_semantics<parallel>], iteration_bounds = array<i64: 2>, scalar_prefetch = 0 : i64, scratch_operands = 0 : i64, tpu.core_type = #tpu.core_type<tc>, window_params = [{transform_indices = @transform_0, window_bounds = array<i64: 72, 256>}, {pipeline_mode = #tpu.pipeline_mode<synchronous>, transform_indices = @transform_1, window_bounds = array<i64: 8, 72>}, {pipeline_mode = #tpu.pipeline_mode<synchronous>, transform_indices = @transform_2, window_bounds = array<i64: 72, 1>}, {pipeline_mode = #tpu.pipeline_mode<synchronous>, transform_indices = @transform_3, window_bounds = array<i64: 72, 1>}, {transform_indices = @transform_4, window_bounds = array<i64: 8, 256>}, {transform_indices = @transform_5, window_bounds = array<i64: 1, 8, 1>}, {transform_indices = @transform_6, window_bounds = array<i64: 1, 8, 1>}]} {
    %c0 = arith.constant 0 : index
    %c0_0 = arith.constant 0 : index
    %0 = vector.load %arg1[%c0, %c0_0] : memref<72x256xbf16, #tpu.memory_space<vmem>>, vector<72x256xbf16>
    %1 = arith.extf %0 : vector<72x256xbf16> to vector<72x256xf32>
    %c0_1 = arith.constant 0 : index
    %c0_2 = arith.constant 0 : index
    %2 = vector.load %arg3[%c0_1, %c0_2] : memref<72x1xf32, #tpu.memory_space<vmem>>, vector<72x1xf32>
    %3 = vector.broadcast %2 : vector<72x1xf32> to vector<72x256xf32>
    %4 = arith.mulf %1, %3 : vector<72x256xf32>
    %c0_3 = arith.constant 0 : index
    %c0_4 = arith.constant 0 : index
    %5 = vector.load %arg4[%c0_3, %c0_4] : memref<72x1xf32, #tpu.memory_space<vmem>>, vector<72x1xf32>
    %6 = vector.broadcast %5 : vector<72x1xf32> to vector<72x256xf32>
    %7 = arith.addf %4, %6 : vector<72x256xf32>
    %cst = arith.constant 0.000000e+00 : f32
    %8 = vector.broadcast %cst : f32 to vector<72x256xf32>
    %9 = arith.maximumf %7, %8 : vector<72x256xf32>
    %c0_5 = arith.constant 0 : index
    %c0_6 = arith.constant 0 : index
    %10 = vector.load %arg2[%c0_5, %c0_6] : memref<8x72xbf16, #tpu.memory_space<vmem>>, vector<8x72xbf16>
    %11 = arith.truncf %9 : vector<72x256xf32> to vector<72x256xbf16>
    %cst_7 = arith.constant dense<0.000000e+00> : vector<8x256xf32>
    %12 = tpu.matmul %10, %11, %cst_7 {dimension_numbers = #tpu.dot_dimension_numbers<[1], [0], [0], [1], [0, 0, 1, 1], [], []>} : vector<8x72xbf16>, vector<72x256xbf16>, vector<8x256xf32> -> vector<8x256xf32>
    %13 = arith.truncf %12 : vector<8x256xf32> to vector<8x256xbf16>
    %c0_8 = arith.constant 0 : index
    %c0_9 = arith.constant 0 : index
    %14 = vector.load %arg5[%c0_8, %c0_9] : memref<8x256xbf16, #tpu.memory_space<vmem>>, vector<8x256xbf16>
    tpu.vector_store %arg5[%c0_8, %c0_9], %13 {strides = array<i32>} : memref<8x256xbf16, #tpu.memory_space<vmem>>, vector<8x256xbf16>,
    %cst_10 = arith.constant dense<0.000000e+00> : vector<8xf32>
    %15 = vector.multi_reduction <add>, %12, %cst_10 [1] : vector<8x256xf32> to vector<8xf32>
    %16 = vector.shape_cast %15 : vector<8xf32> to vector<8x1xf32>
    %17 = vector.shape_cast %16 : vector<8x1xf32> to vector<1x8x1xf32>
    %c0_11 = arith.constant 0 : index
    %c0_12 = arith.constant 0 : index
    %c0_13 = arith.constant 0 : index
    %18 = vector.load %arg6[%c0_11, %c0_12, %c0_13] : memref<1x8x1xf32, #tpu.memory_space<vmem>>, vector<1x8x1xf32>
    tpu.vector_store %arg6[%c0_11, %c0_12, %c0_13], %17 {strides = array<i32>} : memref<1x8x1xf32, #tpu.memory_space<vmem>>, vector<1x8x1xf32>,
    %19 = arith.mulf %12, %12 : vector<8x256xf32>
    %cst_14 = arith.constant dense<0.000000e+00> : vector<8xf32>
    %20 = vector.multi_reduction <add>, %19, %cst_14 [1] : vector<8x256xf32> to vector<8xf32>
    %21 = vector.shape_cast %20 : vector<8xf32> to vector<8x1xf32>
    %22 = vector.shape_cast %21 : vector<8x1xf32> to vector<1x8x1xf32>
    %c0_15 = arith.constant 0 : index
    %c0_16 = arith.constant 0 : index
    %c0_17 = arith.constant 0 : index
    %23 = vector.load %arg7[%c0_15, %c0_16, %c0_17] : memref<1x8x1xf32, #tpu.memory_space<vmem>>, vector<1x8x1xf32>
    tpu.vector_store %arg7[%c0_15, %c0_16, %c0_17], %22 {strides = array<i32>} : memref<1x8x1xf32, #tpu.memory_space<vmem>>, vector<1x8x1xf32>,
    return
  }
  func.func @transform_0(%arg0: i32) -> (i32, i32) {
    %c0_i32 = arith.constant 0 : i32
    %c0_i32_0 = arith.constant 0 : i32
    return %c0_i32, %arg0 : i32, i32
  }
  func.func @transform_1(%arg0: i32) -> (i32, i32) {
    %c0_i32 = arith.constant 0 : i32
    %c0_i32_0 = arith.constant 0 : i32
    %c0_i32_1 = arith.constant 0 : i32
    return %c0_i32, %c0_i32_0 : i32, i32
  }
  func.func @transform_2(%arg0: i32) -> (i32, i32) {
    %c0_i32 = arith.constant 0 : i32
    %c0_i32_0 = arith.constant 0 : i32
    %c0_i32_1 = arith.constant 0 : i32
    return %c0_i32, %c0_i32_0 : i32, i32
  }
  func.func @transform_3(%arg0: i32) -> (i32, i32) {
    %c0_i32 = arith.constant 0 : i32
    %c0_i32_0 = arith.constant 0 : i32
    %c0_i32_1 = arith.constant 0 : i32
    return %c0_i32, %c0_i32_0 : i32, i32
  }
  func.func @transform_4(%arg0: i32) -> (i32, i32) {
    %c0_i32 = arith.constant 0 : i32
    %c0_i32_0 = arith.constant 0 : i32
    return %c0_i32, %arg0 : i32, i32
  }
  func.func @transform_5(%arg0: i32) -> (i32, i32, i32) {
    %c0_i32 = arith.constant 0 : i32
    %c0_i32_0 = arith.constant 0 : i32
    %c0_i32_1 = arith.constant 0 : i32
    return %arg0, %c0_i32, %c0_i32_0 : i32, i32, i32
  }
  func.func @transform_6(%arg0: i32) -> (i32, i32, i32) {
    %c0_i32 = arith.constant 0 : i32
    %c0_i32_0 = arith.constant 0 : i32
    %c0_i32_1 = arith.constant 0 : i32
    return %arg0, %c0_i32, %c0_i32_0 : i32, i32, i32
  }
}

module attributes {stable_mosaic.version = 11 : i64} {
  func.func @bn_add_relu_kernel(%arg0: i32, %arg1: memref<8x256xbf16, #tpu.memory_space<vmem>>, %arg2: memref<8x256xf32, #tpu.memory_space<vmem>>, %arg3: memref<8x1xf32, #tpu.memory_space<vmem>>, %arg4: memref<8x1xf32, #tpu.memory_space<vmem>>, %arg5: memref<8x256xf32, #tpu.memory_space<vmem>>) attributes {dimension_semantics = [#tpu.dimension_semantics<parallel>], iteration_bounds = array<i64: 2>, scalar_prefetch = 0 : i64, scratch_operands = 0 : i64, tpu.core_type = #tpu.core_type<tc>, window_params = [{transform_indices = @transform_0, window_bounds = array<i64: 8, 256>}, {transform_indices = @transform_1, window_bounds = array<i64: 8, 256>}, {pipeline_mode = #tpu.pipeline_mode<synchronous>, transform_indices = @transform_2, window_bounds = array<i64: 8, 1>}, {pipeline_mode = #tpu.pipeline_mode<synchronous>, transform_indices = @transform_3, window_bounds = array<i64: 8, 1>}, {transform_indices = @transform_4, window_bounds = array<i64: 8, 256>}]} {
    %c0 = arith.constant 0 : index
    %c0_0 = arith.constant 0 : index
    %0 = vector.load %arg1[%c0, %c0_0] : memref<8x256xbf16, #tpu.memory_space<vmem>>, vector<8x256xbf16>
    %1 = arith.extf %0 : vector<8x256xbf16> to vector<8x256xf32>
    %c0_1 = arith.constant 0 : index
    %c0_2 = arith.constant 0 : index
    %2 = vector.load %arg3[%c0_1, %c0_2] : memref<8x1xf32, #tpu.memory_space<vmem>>, vector<8x1xf32>
    %3 = vector.broadcast %2 : vector<8x1xf32> to vector<8x256xf32>
    %4 = arith.mulf %1, %3 : vector<8x256xf32>
    %c0_3 = arith.constant 0 : index
    %c0_4 = arith.constant 0 : index
    %5 = vector.load %arg4[%c0_3, %c0_4] : memref<8x1xf32, #tpu.memory_space<vmem>>, vector<8x1xf32>
    %6 = vector.broadcast %5 : vector<8x1xf32> to vector<8x256xf32>
    %7 = arith.addf %4, %6 : vector<8x256xf32>
    %c0_5 = arith.constant 0 : index
    %c0_6 = arith.constant 0 : index
    %8 = vector.load %arg2[%c0_5, %c0_6] : memref<8x256xf32, #tpu.memory_space<vmem>>, vector<8x256xf32>
    %9 = arith.addf %7, %8 : vector<8x256xf32>
    %cst = arith.constant 0.000000e+00 : f32
    %10 = vector.broadcast %cst : f32 to vector<8x256xf32>
    %11 = arith.maximumf %9, %10 : vector<8x256xf32>
    %c0_7 = arith.constant 0 : index
    %c0_8 = arith.constant 0 : index
    %12 = vector.load %arg5[%c0_7, %c0_8] : memref<8x256xf32, #tpu.memory_space<vmem>>, vector<8x256xf32>
    tpu.vector_store %arg5[%c0_7, %c0_8], %11 {strides = array<i32>} : memref<8x256xf32, #tpu.memory_space<vmem>>, vector<8x256xf32>,
    return
  }
  func.func @transform_0(%arg0: i32) -> (i32, i32) {
    %c0_i32 = arith.constant 0 : i32
    %c0_i32_0 = arith.constant 0 : i32
    return %c0_i32, %arg0 : i32, i32
  }
  func.func @transform_1(%arg0: i32) -> (i32, i32) {
    %c0_i32 = arith.constant 0 : i32
    %c0_i32_0 = arith.constant 0 : i32
    return %c0_i32, %arg0 : i32, i32
  }
  func.func @transform_2(%arg0: i32) -> (i32, i32) {
    %c0_i32 = arith.constant 0 : i32
    %c0_i32_0 = arith.constant 0 : i32
    %c0_i32_1 = arith.constant 0 : i32
    return %c0_i32, %c0_i32_0 : i32, i32
  }
  func.func @transform_3(%arg0: i32) -> (i32, i32) {
    %c0_i32 = arith.constant 0 : i32
    %c0_i32_0 = arith.constant 0 : i32
    %c0_i32_1 = arith.constant 0 : i32
    return %c0_i32, %c0_i32_0 : i32, i32
  }
  func.func @transform_4(%arg0: i32) -> (i32, i32) {
    %c0_i32 = arith.constant 0 : i32
    %c0_i32_0 = arith.constant 0 : i32
    return %c0_i32, %arg0 : i32, i32
  }
}

</mosaic_0001>

<bundles_post_ra>
// kernel: residual_block.3
= control target key start
LH: loop header
LB: loop body
LE: loop exit
PB: predicated region body
PF: predicated region fallthrough
CT: control target
= control target key end

     0   :  { %s650_s15 = smov 0   ;;  %s652_s16 = smov 0   ;;  %s733_s0 = inlined_call_operand.vmem [shape: bf16[72,512], index: 0, kind: input, shape index: {}]   ;;  %s734_s1 = inlined_call_operand.vmem [shape: bf16[8,72], index: 1, kind: input, shape index: {}]   ;;  %s735_s2 = inlined_call_operand.vmem [shape: bf16[8,512], index: 2, kind: output, shape index: {0}]   ;;  %s736_s3 = inlined_call_operand.vmem [shape: f32[2,8,1], index: 3, kind: output, shape index: {1}]   ;;  %s737_s4 = inlined_call_operand.vmem [shape: f32[2,8,1], index: 4, kind: output, shape index: {2}]  }
   0x1   :  { %s654_s17 = smov 0  }
   0x2 LB: > { %s666_s18 = sadd.s32 4294967295, %s623_s17   ;;  %s669_s19 = sadd.s32 1, %s623_s17   ;;  %s623_s17 = sphi %s654_s17, %s740_s17   ;;  %s619_s16 = sphi %s652_s16, %s739_s16   ;;  %s615_s15 = sphi %s650_s15, %s738_s15  }
   0x3   : > { %s19_s20 = ssub.s32 %s623_s17, %s669_s19  ;;  %s22_s21 = sadd.s32 1, %s619_s16 }
   0x4   : > { %p20_p0 = scmp.eq.s32.totalorder %s19_s20, 0  ;;  %p29_p1 = scmp.ne.s32.totalorder %s619_s16, %s615_s15 }
   0x5   : > { %p30_p2 = scmp.eq.s32.totalorder %s623_s17, 0  ;;  %p522_p4 = scmp.ge.s32.totalorder %s623_s17, 2 }
   0x6   : > { %s678_s22 = scalar_select %p20_p0, %s619_s16, %s22_s21  }
   0x7   : > { %p31_p3 = por %p30_p2, %p29_p1  ;;  %157 = sbr.rel (%p522_p4) target bundleno = 25 (0x19), region = 20 }
   0xc   : > { %160 = sbr.rel (!%p31_p3) target bundleno = 25 (0x19), region = 24  ;;  %s162_s23 = sand.u32 (%p31_p3), 1, %s619_s16  }
   0xd   : > { %s566_s24 = sshll.u32 (%p31_p3), %s623_s17, 3  ;;  %s575_s25 = smul.u32 (%p31_p3), 72, %s162_s23 }
   0xe   : > { %s167_s28 = scalar_lea.vmem (%p31_p3), %s733_s0, %s566_s24 }
   0xf   : > { %v212_v0 = vld [vmem:[%s167_s28] sm:$0xff] (%p31_p3)  ;;  %v214_v1 = vld [vmem:[%s167_s28 + $0x10] sm:$0xff] (%p31_p3)  ;;  %s164_s29 = scalar_lea.vmem (%p31_p3), [#allocation2], %s575_s25 }
  0x10   : > { %v216_v2 = vld [vmem:[%s167_s28 + $0x20] sm:$0xff] (%p31_p3)  ;;  %213 = vst [vmem:[%s164_s29] sm:$0xff] (%p31_p3), %v212_v0  ;;  %v218_v3 = vld [vmem:[%s167_s28 + $0x30] sm:$0xff] (%p31_p3) }
  0x11   : > { %215 = vst [vmem:[%s164_s29 + $0x8] sm:$0xff] %v214_v1  ;;  %v220_v4 = vld [vmem:[%s167_s28 + $0x40] sm:$0xff]  ;;  %v222_v5 = vld [vmem:[%s167_s28 + $0x50] sm:$0xff] }
  0x12   : > { %217 = vst [vmem:[%s164_s29 + $0x10] sm:$0xff] %v216_v2  ;;  %v224_v6 = vld [vmem:[%s167_s28 + $0x60] sm:$0xff]  ;;  %v226_v7 = vld [vmem:[%s167_s28 + $0x70] sm:$0xff] }
  0x13   : > { %219 = vst [vmem:[%s164_s29 + $0x18] sm:$0xff] %v218_v3  ;;  %v228_v8 = vld [vmem:[%s167_s28 + $0x80] sm:$0xff] }
  0x14   : > { %221 = vst [vmem:[%s164_s29 + $0x20] sm:$0xff] %v220_v4 }
  0x15   : > { %223 = vst [vmem:[%s164_s29 + $0x28] sm:$0xff] %v222_v5 }
  0x16   : > { %225 = vst [vmem:[%s164_s29 + $0x30] sm:$0xff] %v224_v6 }
  0x17   : > { %227 = vst [vmem:[%s164_s29 + $0x38] sm:$0xff] %v226_v7 }
  0x18   : > { %229 = vst [vmem:[%s164_s29 + $0x40] sm:$0xff] %v228_v8 }
  0x19 PF: > { %p525_p5 = scmp.ge.s32.totalorder %s623_s17, 1  ;;  %p234_p6 = scmp.lt.s32.totalorder %s623_s17, 3 }
  0x1b   : > { %p235_p7 = pnand %p525_p5, %p234_p6 }
  0x1c   : > { %s241_s30 = sand.u32 (!%p235_p7), 1, %s615_s15   ;;  %s526_s9 = sshll.u32 (!%p235_p7), %s666_s18, 1 }
  0x1d   : > { %238 = sbr.rel (%p235_p7) target bundleno = 312 (0x138), region = 62  ;;  %p276_p8 = scmp.lt.s32.totalorder (!%p235_p7), %s526_s9, 3 }
  0x1e   : > { %s576_s5 = smul.u32 (!%p235_p7), 72, %s241_s30  ;;  %p281_p9 = scmp.lt.s32.totalorder (!%p235_p7), %s666_s18, 1 }
  0x20   : > { %s689_s6 = scalar_lea.vmem (!%p235_p7), [#allocation2], %s576_s5 }
  0x22   : > { %v299_v9 = vld [vmem:[%s689_s6 + $0x40] sm:$0xff]  ;;  %vm349_vm0 = vcmask 1043456   ;;  %v556_v12 = vld [vmem:[%s689_s6 + $0x30] sm:$0xf]  ;;  %v574_v15 = vld [vmem:[%s689_s6 + $0x34] sm:$0xf0] }
  0x23   : > { %v325_v10 = vunpack.c.l.b16 %v299_v9  ;;  %v326_v11 = vunpack.c.h.b16 %v299_v9  ;;  %v573_v16 = vld [vmem:[%s689_s6 + $0x34] sm:$0xf]  ;;  %v558_v17 = vld [vmem:[%s689_s6 + $0x38] sm:$0xf0]  ;;  %v557_v20 = vor.u32 %v574_v15, %v556_v12  ;;  %v548_v22 = vld [vmem:[%s689_s6 + $0x20] sm:$0xf] }
  0x24   : > { %v561_v21 = vor.u32 %v573_v16, %v558_v17  ;;  %v572_v23 = vld [vmem:[%s689_s6 + $0x24] sm:$0xf0]  ;;  %v571_v24 = vld [vmem:[%s689_s6 + $0x24] sm:$0xf]  ;;  %v550_v25 = vld [vmem:[%s689_s6 + $0x28] sm:$0xf0] }
  0x25   : > { %v335_v13 = vpack.c.b16 %v325_v10, %v325_v10  ;;  %v336_v14 = vpack.c.b16 %v326_v11, %v326_v11  ;;  %v549_v26 = vor.u32 %v572_v23, %v548_v22  ;;  %v553_v27 = vor.u32 %v571_v24, %v550_v25  ;;  %v540_v28 = vld [vmem:[%s689_s6 + $0x10] sm:$0xf]  ;;  %v570_v29 = vld [vmem:[%s689_s6 + $0x14] sm:$0xf0]  ;;  %v569_v30 = vld [vmem:[%s689_s6 + $0x14] sm:$0xf] }
  0x26   : > { %v542_v31 = vld [vmem:[%s689_s6 + $0x18] sm:$0xf0]  ;;  %v541_v32 = vor.u32 %v570_v29, %v540_v28  ;;  %v532_v34 = vld [vmem:[%s689_s6] sm:$0xf]  ;;  %v568_v35 = vld [vmem:[%s689_s6 + $0x4] sm:$0xf0] }
  0x27   : > { %v351_v18 = vsel %vm349_vm0, %v335_v13, 0  ;;  %v354_v19 = vsel %vm349_vm0, %v336_v14, 0  ;;  %v545_v33 = vor.u32 %v569_v30, %v542_v31  ;;  %v567_v36 = vld [vmem:[%s689_s6 + $0x4] sm:$0xf]  ;;  %v534_v37 = vld [vmem:[%s689_s6 + $0x8] sm:$0xf0]  ;;  %v533_v38 = vor.u32 %v568_v35, %v532_v34 }
  0x28   : > { %359 = vmatpush.bf16.msra.mxu0 %v351_v18  ;;  %372 = vmatpush.bf16.msra.mxu1 %v354_v19  ;;  %v537_v39 = vor.u32 %v567_v36, %v534_v37  ;;  %v290_v40 = vld [vmem:[%s734_s1] sm:$0xf]  ;;  %vm345_vm1 = vcmask 588800   ;;  %s742_s9 = smov (!%p276_p8, %s526_s9), 3  ;;  %s744_s18 = smov (!%p281_p9, %s666_s18), 1  ;;  %vm387_vm2 = vcmask 7168  }
  0x29   : > { %s527_s10 = sshll.u32 %s742_s9, 2  ;;  %s528_s14 = sshll.u32 %s744_s18, 3 }
  0x2a   : > { %s279_s13 = scalar_lea.vmem %s735_s2, %s527_s10  ;;  %s284_s20 = scalar_lea.vmem %s736_s3, %s528_s14 }
  0x2b   : > { %s288_s24 = scalar_lea.vmem %s737_s4, %s528_s14 }
  0x2c   : > { %360 = vmatpush.bf16.msra.mxu0 %v557_v20  ;;  %373 = vmatpush.bf16.msra.mxu1 %v561_v21 }
  0x30   : > { %361 = vmatpush.bf16.msra.mxu0 %v549_v26  ;;  %374 = vmatpush.bf16.msra.mxu1 %v553_v27 }
  0x34   : > { %362 = vmatpush.bf16.msra.mxu0 %v541_v32  ;;  %375 = vmatpush.bf16.msra.mxu1 %v545_v33 }
  0x38   : > { %363 = vmatpush.bf16.msra.mxu0 %v533_v38  ;;  %376 = vmatpush.bf16.msra.mxu1 %v537_v39 }
  0x3b   : > { %562 = vmatmul.msk.bf16.vlgmr.msra.gmra.mxu0 %vm345_vm1, %v290_v40  ;;  %563 = vmatmul.msk.bf16.vlgmr.msra.gmra.mxu1 %vm345_vm1, %v290_v40 }
  0xb8   : > { %v365_v41 = vpop.f32.mrf.mxu0  ;;  %v378_v42 = vpop.f32.mrf.mxu1 }
  0xb9   : > { %v382_v43 = vpack.c.bf16 %v378_v42, %v365_v41  ;;  %v384_v44 = vadd.f32 %v378_v42, %v365_v41  ;;  %v389_v45 = vmul.f32 %v365_v41, %v365_v41  ;;  %v390_v46 = vmul.f32 %v378_v42, %v378_v42 }
  0xbb   : > { %383 = vst [vmem:[%s279_s13] sm:$0xff] %v382_v43  ;;  %385 = vadd.xlane.f32.xlu0 %v384_v44  ;;  %v391_v49 = vadd.f32 %v390_v46, %v389_v45 }
  0xc0   : > { %v367_v47 = vpop.f32.mrf.mxu0  ;;  %v380_v48 = vpop.f32.mrf.mxu1 }
  0xc3   : > { %392 = vadd.xlane.f32.xlu0 %v391_v49 }
 0x12e   : > { %v386_v50 = vpop.xlane.xlu0 %385 }
 0x12f   : > { %388 = vst.msk [vmem:[%s284_s20] sm:$0xff] %vm387_vm2, %v386_v50 }
 0x136   : > { %v393_v51 = vpop.xlane.xlu0 %392 }
 0x137   : > { %394 = vst.msk [vmem:[%s288_s24] sm:$0xff] %vm387_vm2, %v393_v51 }
 0x138 PF: > { %p12_p10 = scmp.ge.s32.totalorder %s669_s19, 4   ;;  %s738_s15 = smov %s619_s16 }
 0x139   : > { %s739_s16 = smov %s678_s22  ;;  %s740_s17 = smov %s669_s19 }
 0x13a   :  { %14 = sbr.rel (!%p12_p10) target bundleno = 2 (0x2), region = 125 }

// kernel: residual_block.4
= control target key start
LH: loop header
LB: loop body
LE: loop exit
PB: predicated region body
PF: predicated region fallthrough
CT: control target
= control target key end

     0   :  { %s824_s21 = smov 0   ;;  %s826_s22 = smov 0   ;;  %s953_s0 = inlined_call_operand.vmem [shape: bf16[72,512], index: 0, kind: input, shape index: {}]   ;;  %s954_s1 = inlined_call_operand.vmem [shape: bf16[8,72], index: 1, kind: input, shape index: {}]   ;;  %s955_s2 = inlined_call_operand.vmem [shape: f32[72,1], index: 2, kind: input, shape index: {}]   ;;  %s956_s3 = inlined_call_operand.vmem [shape: f32[72,1], index: 3, kind: input, shape index: {}]   ;;  %s957_s4 = inlined_call_operand.vmem [shape: bf16[8,512], index: 4, kind: output, shape index: {0}]   ;;  %s958_s5 = inlined_call_operand.vmem [shape: f32[2,8,1], index: 5, kind: output, shape index: {1}]   ;;  %s959_s6 = inlined_call_operand.vmem [shape: f32[2,8,1], index: 6, kind: output, shape index: {2}]  }
   0x1   :  { %s828_s23 = smov 0  }
   0x2 LB: > { %s840_s24 = sadd.s32 4294967295, %s786_s23   ;;  %s843_s25 = sadd.s32 1, %s786_s23   ;;  %s786_s23 = sphi %s828_s23, %s962_s23   ;;  %s782_s22 = sphi %s826_s22, %s961_s22   ;;  %s778_s21 = sphi %s824_s21, %s960_s21  }
   0x3   : > { %s21_s26 = ssub.s32 %s786_s23, %s843_s25  ;;  %s24_s27 = sadd.s32 1, %s782_s22 }
   0x4   : > { %p22_p0 = scmp.eq.s32.totalorder %s21_s26, 0  ;;  %p31_p1 = scmp.ne.s32.totalorder %s782_s22, %s778_s21 }
   0x5   : > { %p32_p2 = scmp.eq.s32.totalorder %s786_s23, 0  ;;  %p721_p4 = scmp.ge.s32.totalorder %s786_s23, 2 }
   0x6   : > { %s852_s28 = scalar_select %p22_p0, %s782_s22, %s24_s27  }
   0x7   : > { %p33_p3 = por %p32_p2, %p31_p1  ;;  %207 = sbr.rel (%p721_p4) target bundleno = 25 (0x19), region = 28 }
   0xc   : > { %210 = sbr.rel (!%p33_p3) target bundleno = 25 (0x19), region = 32  ;;  %s212_s29 = sand.u32 (%p33_p3), 1, %s782_s22  }
   0xd   : > { %s733_s30 = sshll.u32 (%p33_p3), %s786_s23, 3  ;;  %s734_s7 = smul.u32 (%p33_p3), 72, %s212_s29 }
   0xe   : > { %s217_s10 = scalar_lea.vmem (%p33_p3), %s953_s0, %s733_s30 }
   0xf   : > { %v262_v0 = vld [vmem:[%s217_s10] sm:$0xff] (%p33_p3)  ;;  %v264_v1 = vld [vmem:[%s217_s10 + $0x10] sm:$0xff] (%p33_p3)  ;;  %s214_s11 = scalar_lea.vmem (%p33_p3), [#allocation2], %s734_s7 }
  0x10   : > { %v266_v2 = vld [vmem:[%s217_s10 + $0x20] sm:$0xff] (%p33_p3)  ;;  %263 = vst [vmem:[%s214_s11] sm:$0xff] (%p33_p3), %v262_v0  ;;  %v268_v3 = vld [vmem:[%s217_s10 + $0x30] sm:$0xff] (%p33_p3) }
  0x11   : > { %265 = vst [vmem:[%s214_s11 + $0x8] sm:$0xff] %v264_v1  ;;  %v270_v4 = vld [vmem:[%s217_s10 + $0x40] sm:$0xff]  ;;  %v272_v5 = vld [vmem:[%s217_s10 + $0x50] sm:$0xff] }
  0x12   : > { %267 = vst [vmem:[%s214_s11 + $0x10] sm:$0xff] %v266_v2  ;;  %v274_v6 = vld [vmem:[%s217_s10 + $0x60] sm:$0xff]  ;;  %v276_v7 = vld [vmem:[%s217_s10 + $0x70] sm:$0xff] }
  0x13   : > { %269 = vst [vmem:[%s214_s11 + $0x18] sm:$0xff] %v268_v3  ;;  %v278_v8 = vld [vmem:[%s217_s10 + $0x80] sm:$0xff] }
  0x14   : > { %271 = vst [vmem:[%s214_s11 + $0x20] sm:$0xff] %v270_v4 }
  0x15   : > { %273 = vst [vmem:[%s214_s11 + $0x28] sm:$0xff] %v272_v5 }
  0x16   : > { %275 = vst [vmem:[%s214_s11 + $0x30] sm:$0xff] %v274_v6 }
  0x17   : > { %277 = vst [vmem:[%s214_s11 + $0x38] sm:$0xff] %v276_v7 }
  0x18   : > { %279 = vst [vmem:[%s214_s11 + $0x40] sm:$0xff] %v278_v8 }
  0x19 PF: > { %p724_p5 = scmp.ge.s32.totalorder %s786_s23, 1  ;;  %p284_p6 = scmp.lt.s32.totalorder %s786_s23, 3 }
  0x1b   : > { %p285_p7 = pnand %p724_p5, %p284_p6 }
  0x1c   : > { %s291_s10 = sand.u32 (!%p285_p7), 1, %s778_s21   ;;  %s725_s14 = sshll.u32 (!%p285_p7), %s840_s24, 1 }
  0x1d   : > { %288 = sbr.rel (%p285_p7) target bundleno = 450 (0x1c2), region = 70  ;;  %p330_p8 = scmp.lt.s32.totalorder (!%p285_p7), %s725_s14, 3 }
  0x1e   : > { %s735_s11 = smul.u32 (!%p285_p7), 72, %s291_s10  ;;  %p335_p9 = scmp.lt.s32.totalorder (!%p285_p7), %s840_s24, 1 }
  0x20   : > { %s917_s12 = scalar_lea.vmem (!%p285_p7), [#allocation2], %s735_s11 }
  0x22   : > { %v449_v9 = vld [vmem:[%s956_s3 + $0x30] sm:$0xff]  ;;  %v379_v10 = vld [vmem:[%s955_s2 + $0x40] sm:$0xff]  ;;  %v788_v12 = vmov 0   ;;  %v450_v13 = vld [vmem:[%s956_s3 + $0x38] sm:$0xff]  ;;  %vm548_vm0 = vcmask 1043456   ;;  %vm544_vm1 = vcmask 588800  }
  0x23   : > { %v377_v11 = vld [vmem:[%s955_s2 + $0x30] sm:$0xff]  ;;  %763 = vset.pattern.permute.xlu2 %v788_v12  ;;  %762 = vset.pattern.permute.xlu1 %v788_v12  ;;  %v451_v14 = vld [vmem:[%s956_s3 + $0x40] sm:$0xff]  ;;  %v378_v15 = vld [vmem:[%s955_s2 + $0x38] sm:$0xff]  ;;  %s964_s14 = smov (!%p330_p8, %s725_s14), 3  ;;  %s966_s24 = smov (!%p335_p9, %s840_s24), 1  ;;  %vm586_vm2 = vcmask 7168  }
  0x24   : > { %761 = vset.pattern.permute.xlu0 %v788_v12  ;;  %484 = vperm.xlu2 %763, %v449_v9   ;;  %v447_v16 = vld [vmem:[%s956_s3 + $0x20] sm:$0xff]  ;;  %v376_v17 = vld [vmem:[%s955_s2 + $0x28] sm:$0xff]  ;;  %v374_v19 = vld [vmem:[%s955_s2 + $0x18] sm:$0xff]  ;;  %s726_s15 = sshll.u32 %s964_s14, 2  ;;  %s727_s19 = sshll.u32 %s966_s24, 3 }
  0x25   : > { %422 = vperm.xlu0 %761, %v379_v10   ;;  %412 = vperm.xlu1 %762, %v377_v11   ;;  %v375_v18 = vld [vmem:[%s955_s2 + $0x20] sm:$0xff]  ;;  %v448_v20 = vld [vmem:[%s956_s3 + $0x28] sm:$0xff]  ;;  %v373_v21 = vld [vmem:[%s955_s2 + $0x10] sm:$0xff]  ;;  %s333_s18 = scalar_lea.vmem %s957_s4, %s726_s15  ;;  %s338_s26 = scalar_lea.vmem %s958_s5, %s727_s19 }
  0x26   : > { %v371_v22 = vld [vmem:[%s955_s2] sm:$0xff]  ;;  %v445_v23 = vld [vmem:[%s956_s3 + $0x10] sm:$0xff]  ;;  %v446_v24 = vld [vmem:[%s956_s3 + $0x18] sm:$0xff]  ;;  %s342_s30 = scalar_lea.vmem %s959_s6, %s727_s19 }
  0x27   : > { %v444_v25 = vld [vmem:[%s956_s3 + $0x8] sm:$0xff]  ;;  %v443_v26 = vld [vmem:[%s956_s3] sm:$0xff]  ;;  %v350_v33 = vld [vmem:[%s917_s12 + $0x30] sm:$0xff] }
  0x28   : > { %v372_v27 = vld [vmem:[%s955_s2 + $0x8] sm:$0xff]  ;;  %v351_v34 = vld [vmem:[%s917_s12 + $0x38] sm:$0xff]  ;;  %v365_v37 = vunpack.c.l.bf16 %v350_v33  ;;  %v366_v38 = vunpack.c.h.bf16 %v350_v33 }
  0x29   : > { %v352_v30 = vld [vmem:[%s917_s12 + $0x40] sm:$0xff]  ;;  %v367_v39 = vunpack.c.l.bf16 %v351_v34  ;;  %v368_v40 = vunpack.c.h.bf16 %v351_v34  ;;  %v349_v4 = vld [vmem:[%s917_s12 + $0x28] sm:$0xff] }
  0x2a   : > { %v369_v35 = vunpack.c.l.bf16 %v352_v30  ;;  %v370_v36 = vunpack.c.h.bf16 %v352_v30  ;;  %v348_v58 = vld [vmem:[%s917_s12 + $0x20] sm:$0xff]  ;;  %v363_v10 = vunpack.c.l.bf16 %v349_v4  ;;  %v364_v11 = vunpack.c.h.bf16 %v349_v4 }
  0x2b   : > { %v361_v63 = vunpack.c.l.bf16 %v348_v58  ;;  %v362_v0 = vunpack.c.h.bf16 %v348_v58 }
  0x2c   : > { %489 = vperm.xlu2 %763, %v450_v13  }
  0x2d   : > { %494 = vperm.xlu0 %761, %v451_v14   ;;  %417 = vperm.xlu1 %762, %v378_v15   ;;  %v347_v15 = vld [vmem:[%s917_s12 + $0x18] sm:$0xff] }
  0x34   : > { %474 = vperm.xlu2 %763, %v447_v16  }
  0x35   : > { %407 = vperm.xlu1 %762, %v376_v17   ;;  %402 = vperm.xlu0 %761, %v375_v18  }
  0x3c   : > { %397 = vperm.xlu2 %763, %v374_v19  }
  0x3d   : > { %479 = vperm.xlu0 %761, %v448_v20   ;;  %392 = vperm.xlu1 %762, %v373_v21   ;;  %v346_v20 = vld [vmem:[%s917_s12 + $0x10] sm:$0xff] }
  0x44   : > { %382 = vperm.xlu2 %763, %v371_v22  }
  0x45   : > { %464 = vperm.xlu0 %761, %v445_v23   ;;  %469 = vperm.xlu1 %762, %v446_v24  }
  0x4c   : > { %459 = vperm.xlu2 %763, %v444_v25   ;;  %v359_v25 = vunpack.c.l.bf16 %v347_v15 }
  0x4d   : > { %454 = vperm.xlu1 %762, %v443_v26   ;;  %387 = vperm.xlu0 %761, %v372_v27   ;;  %v360_v26 = vunpack.c.h.bf16 %v347_v15  ;;  %v357_v27 = vunpack.c.l.bf16 %v346_v20 }
  0x7e   : > { %v485_v28 = vpop.permute.xlu2 %484 }
  0x86   : > { %v490_v32 = vpop.permute.xlu2 %489 }
  0x8e   : > { %v475_v51 = vpop.permute.xlu2 %474 }
  0x96   : > { %v398_v14 = vpop.permute.xlu2 %397 }
  0x97   : > { %v423_v29 = vpop.permute.xlu0 %422  ;;  %v413_v31 = vpop.permute.xlu1 %412 }
  0x98   : > { %v441_v41 = vmul.f32 %v423_v29, %v369_v35  ;;  %v442_v42 = vmul.f32 %v423_v29, %v370_v36  ;;  %v437_v43 = vmul.f32 %v413_v31, %v365_v37  ;;  %v438_v44 = vmul.f32 %v413_v31, %v366_v38  ;;  %v344_v38 = vld [vmem:[%s917_s12] sm:$0xff] }
  0x99   : > { %v431_v35 = vmul.f32 %v398_v14, %v359_v25  ;;  %v432_v36 = vmul.f32 %v398_v14, %v360_v26 }
  0x9a   : > { %v509_v56 = vadd.f32 %v485_v28, %v437_v43  ;;  %v510_v57 = vadd.f32 %v485_v28, %v438_v44  ;;  %v358_v28 = vunpack.c.h.bf16 %v346_v20 }
  0x9c   : > { %v527_v6 = vmax.f32 %v509_v56, 0.0  ;;  %v528_v7 = vmax.f32 %v510_v57, 0.0 }
  0x9e   : > { %v383_v37 = vpop.permute.xlu2 %382 }
  0x9f   : > { %v495_v45 = vpop.permute.xlu0 %494  ;;  %v418_v46 = vpop.permute.xlu1 %417 }
  0xa0   : > { %v513_v47 = vadd.f32 %v495_v45, %v441_v41  ;;  %v514_v48 = vadd.f32 %v495_v45, %v442_v42  ;;  %v439_v49 = vmul.f32 %v418_v46, %v367_v39  ;;  %v440_v50 = vmul.f32 %v418_v46, %v368_v40 }
  0xa2   : > { %v511_v52 = vadd.f32 %v490_v32, %v439_v49  ;;  %v512_v53 = vadd.f32 %v490_v32, %v440_v50  ;;  %v531_v54 = vmax.f32 %v513_v47, 0.0  ;;  %v532_v55 = vmax.f32 %v514_v48, 0.0  ;;  %v345_v49 = vld [vmem:[%s917_s12 + $0x8] sm:$0xff] }
  0xa3   : > { %v353_v47 = vunpack.c.l.bf16 %v344_v38  ;;  %v354_v48 = vunpack.c.h.bf16 %v344_v38  ;;  %v355_v56 = vunpack.c.l.bf16 %v345_v49  ;;  %v356_v57 = vunpack.c.h.bf16 %v345_v49 }
  0xa4   : > { %v542_v59 = vpack.c.bf16 %v531_v54, %v531_v54  ;;  %v543_v60 = vpack.c.bf16 %v532_v55, %v532_v55  ;;  %v529_v61 = vmax.f32 %v511_v52, 0.0  ;;  %v530_v62 = vmax.f32 %v512_v53, 0.0 }
  0xa5   : > { %v425_v58 = vmul.f32 %v383_v37, %v353_v47 }
  0xa6   : > { %v550_v1 = vsel %vm548_vm0, %v542_v59, 0  ;;  %v553_v2 = vsel %vm548_vm0, %v543_v60, 0  ;;  %v540_v8 = vpack.c.bf16 %v529_v61, %v527_v6  ;;  %v541_v9 = vpack.c.bf16 %v530_v62, %v528_v7 }
  0xa7   : > { %v408_v3 = vpop.permute.xlu1 %407  ;;  %v403_v5 = vpop.permute.xlu0 %402  ;;  %558 = vmatpush.bf16.msra.mxu0 %v550_v1  ;;  %571 = vmatpush.bf16.msra.mxu1 %v553_v2  ;;  %v426_v59 = vmul.f32 %v383_v37, %v354_v48 }
  0xa8   : > { %v433_v12 = vmul.f32 %v403_v5, %v361_v63  ;;  %v434_v13 = vmul.f32 %v403_v5, %v362_v0  ;;  %v435_v16 = vmul.f32 %v408_v3, %v363_v10  ;;  %v436_v17 = vmul.f32 %v408_v3, %v364_v11  ;;  %v460_v2 = vpop.permute.xlu2 %459  ;;  %v533_v11 = vld [vmem:[%s954_s1] sm:$0xf] }
  0xaa   : > { %v505_v18 = vadd.f32 %v475_v51, %v433_v12  ;;  %v506_v19 = vadd.f32 %v475_v51, %v434_v13 }
  0xab   : > { %559 = vmatpush.bf16.msra.mxu0 %v540_v8  ;;  %572 = vmatpush.bf16.msra.mxu1 %v541_v9 }
  0xac   : > { %v523_v31 = vmax.f32 %v505_v18, 0.0  ;;  %v524_v32 = vmax.f32 %v506_v19, 0.0 }
  0xaf   : > { %v480_v21 = vpop.permute.xlu0 %479  ;;  %v393_v22 = vpop.permute.xlu1 %392 }
  0xb0   : > { %v507_v23 = vadd.f32 %v480_v21, %v435_v16  ;;  %v508_v24 = vadd.f32 %v480_v21, %v436_v17  ;;  %v429_v39 = vmul.f32 %v393_v22, %v357_v27  ;;  %v430_v40 = vmul.f32 %v393_v22, %v358_v28 }
  0xb2   : > { %v525_v29 = vmax.f32 %v507_v23, 0.0  ;;  %v526_v30 = vmax.f32 %v508_v24, 0.0 }
  0xb4   : > { %v538_v33 = vpack.c.bf16 %v525_v29, %v523_v31  ;;  %v539_v34 = vpack.c.bf16 %v526_v30, %v524_v32 }
  0xb6   : > { %560 = vmatpush.bf16.msra.mxu0 %v538_v33  ;;  %573 = vmatpush.bf16.msra.mxu1 %v539_v34 }
  0xb7   : > { %v465_v41 = vpop.permute.xlu0 %464  ;;  %v470_v42 = vpop.permute.xlu1 %469 }
  0xb8   : > { %v501_v43 = vadd.f32 %v465_v41, %v429_v39  ;;  %v502_v44 = vadd.f32 %v465_v41, %v430_v40  ;;  %v503_v45 = vadd.f32 %v470_v42, %v431_v35  ;;  %v504_v46 = vadd.f32 %v470_v42, %v432_v36 }
  0xba   : > { %v519_v50 = vmax.f32 %v501_v43, 0.0  ;;  %v520_v51 = vmax.f32 %v502_v44, 0.0  ;;  %v521_v52 = vmax.f32 %v503_v45, 0.0  ;;  %v522_v53 = vmax.f32 %v504_v46, 0.0 }
  0xbc   : > { %v536_v54 = vpack.c.bf16 %v521_v52, %v519_v50  ;;  %v537_v55 = vpack.c.bf16 %v522_v53, %v520_v51 }
  0xbe   : > { %561 = vmatpush.bf16.msra.mxu0 %v536_v54  ;;  %574 = vmatpush.bf16.msra.mxu1 %v537_v55 }
  0xbf   : > { %v455_v60 = vpop.permute.xlu1 %454  ;;  %v388_v61 = vpop.permute.xlu0 %387 }
  0xc0   : > { %v497_v62 = vadd.f32 %v455_v60, %v425_v58  ;;  %v498_v63 = vadd.f32 %v455_v60, %v426_v59  ;;  %v427_v0 = vmul.f32 %v388_v61, %v355_v56  ;;  %v428_v1 = vmul.f32 %v388_v61, %v356_v57 }
  0xc2   : > { %v499_v3 = vadd.f32 %v460_v2, %v427_v0  ;;  %v500_v4 = vadd.f32 %v460_v2, %v428_v1  ;;  %v515_v5 = vmax.f32 %v497_v62, 0.0  ;;  %v516_v6 = vmax.f32 %v498_v63, 0.0 }
  0xc4   : > { %v517_v7 = vmax.f32 %v499_v3, 0.0  ;;  %v518_v8 = vmax.f32 %v500_v4, 0.0 }
  0xc6   : > { %v534_v9 = vpack.c.bf16 %v517_v7, %v515_v5  ;;  %v535_v10 = vpack.c.bf16 %v518_v8, %v516_v6 }
  0xc8   : > { %562 = vmatpush.bf16.msra.mxu0 %v534_v9  ;;  %575 = vmatpush.bf16.msra.mxu1 %v535_v10 }
  0xcb   : > { %729 = vmatmul.msk.bf16.vlgmr.msra.gmra.mxu0 %vm544_vm1, %v533_v11  ;;  %730 = vmatmul.msk.bf16.vlgmr.msra.gmra.mxu1 %vm544_vm1, %v533_v11 }
 0x148   : > { %v564_v12 = vpop.f32.mrf.mxu0  ;;  %v577_v13 = vpop.f32.mrf.mxu1 }
 0x149   : > { %v581_v14 = vpack.c.bf16 %v577_v13, %v564_v12  ;;  %v583_v15 = vadd.f32 %v577_v13, %v564_v12  ;;  %v588_v16 = vmul.f32 %v564_v12, %v564_v12  ;;  %v589_v17 = vmul.f32 %v577_v13, %v577_v13 }
 0x14b   : > { %582 = vst [vmem:[%s333_s18] sm:$0xff] %v581_v14  ;;  %584 = vadd.xlane.f32.xlu0 %v583_v15  ;;  %v590_v18 = vadd.f32 %v589_v17, %v588_v16 }
 0x14d   : > { %591 = vadd.xlane.f32.xlu1 %v590_v18 }
 0x150   : > { %v566_v19 = vpop.f32.mrf.mxu0  ;;  %v579_v20 = vpop.f32.mrf.mxu1 }
 0x1be   : > { %v585_v21 = vpop.xlane.xlu0 %584 }
 0x1bf   : > { %587 = vst.msk [vmem:[%s338_s26] sm:$0xff] %vm586_vm2, %v585_v21 }
 0x1c0   : > { %v592_v22 = vpop.xlane.xlu1 %591 }
 0x1c1   : > { %593 = vst.msk [vmem:[%s342_s30] sm:$0xff] %vm586_vm2, %v592_v22 }
 0x1c2 PF: > { %p14_p10 = scmp.ge.s32.totalorder %s843_s25, 4   ;;  %s960_s21 = smov %s782_s22 }
 0x1c3   : > { %s961_s22 = smov %s852_s28  ;;  %s962_s23 = smov %s843_s25 }
 0x1c4   :  { %16 = sbr.rel (!%p14_p10) target bundleno = 2 (0x2), region = 133 }

// kernel: residual_block.5
= control target key start
LH: loop header
LB: loop body
LE: loop exit
PB: predicated region body
PF: predicated region fallthrough
CT: control target
= control target key end

     0   :  { %s375_s15 = smov 0   ;;  %s401_s0 = inlined_call_operand.vmem [shape: bf16[8,512], index: 0, kind: input, shape index: {}]   ;;  %s402_s1 = inlined_call_operand.vmem [shape: f32[8,512], index: 1, kind: input, shape index: {}]   ;;  %s403_s2 = inlined_call_operand.vmem [shape: f32[8,1], index: 2, kind: input, shape index: {}]   ;;  %s404_s3 = inlined_call_operand.vmem [shape: f32[8,1], index: 3, kind: input, shape index: {}]   ;;  %s405_s4 = inlined_call_operand.vmem [shape: f32[8,512], index: 4, kind: output, shape index: {}]  }
   0x1 LB: > { %s318_s16 = sadd.s32 4294967295, %s347_s15   ;;  %p322_p0 = scmp.ge.s32.totalorder %s347_s15, 1  ;;  %s347_s15 = sphi %s375_s15, %s14_s15  }
   0x2   : > { %p174_p1 = scmp.lt.s32.totalorder %s347_s15, 3 }
   0x4   : > { %p175_p2 = pnand %p322_p0, %p174_p1 }
   0x5   : > { %s323_s21 = sshll.u32 (!%p175_p2), %s318_s16, 1 }
   0x6   : > { %178 = sbr.rel (%p175_p2) target bundleno = 144 (0x90), region = 36  ;;  %p206_p3 = scmp.lt.s32.totalorder (!%p175_p2), %s323_s21, 3 }
   0xb   : > { %v226_v0 = vld [vmem:[%s403_s2] sm:$0xff]  ;;  %v349_v1 = vmov 0   ;;  %s407_s21 = smov (!%p206_p3, %s323_s21), 3 }
   0xc   : > { %340 = vset.pattern.permute.xlu0 %v349_v1  ;;  %v234_v2 = vld [vmem:[%s404_s3] sm:$0xff]  ;;  %s324_s22 = sshll.u32 %s407_s21, 2  ;;  %s326_s26 = sshll.u32 %s407_s21, 3 }
   0xd   : > { %229 = vperm.xlu0 %340, %v226_v0   ;;  %s209_s25 = scalar_lea.vmem %s401_s0, %s324_s22  ;;  %s215_s29 = scalar_lea.vmem %s402_s1, %s326_s26 }
   0xe   : > { %v223_v4 = vld [vmem:[%s209_s25] sm:$0xff]  ;;  %v243_v11 = vld [vmem:[%s215_s29 + $0x8] sm:$0xff]  ;;  %s221_s6 = scalar_lea.vmem %s405_s4, %s326_s26 }
   0xf   : > { %v224_v5 = vunpack.c.l.bf16 %v223_v4  ;;  %v225_v6 = vunpack.c.h.bf16 %v223_v4  ;;  %v242_v10 = vld [vmem:[%s215_s29] sm:$0xff] }
  0x15   : > { %237 = vperm.xlu0 %340, %v234_v2  }
  0x7f   : > { %v230_v3 = vpop.permute.xlu0 %229 }
  0x80   : > { %v232_v7 = vmul.f32 %v230_v3, %v224_v5  ;;  %v233_v8 = vmul.f32 %v230_v3, %v225_v6 }
  0x87   : > { %v238_v9 = vpop.permute.xlu0 %237 }
  0x88   : > { %v240_v12 = vadd.f32 %v238_v9, %v232_v7  ;;  %v241_v13 = vadd.f32 %v238_v9, %v233_v8 }
  0x8a   : > { %v244_v14 = vadd.f32 %v242_v10, %v240_v12  ;;  %v245_v15 = vadd.f32 %v243_v11, %v241_v13 }
  0x8c   : > { %v246_v16 = vmax.f32 %v244_v14, 0.0  ;;  %v247_v17 = vmax.f32 %v245_v15, 0.0 }
  0x8e   : > { %248 = vst [vmem:[%s221_s6] sm:$0xff] %v246_v16 }
  0x8f   : > { %249 = vst [vmem:[%s221_s6 + $0x8] sm:$0xff] %v247_v17 }
  0x90 PF: > { %s14_s15 = sadd.s32 1, %s347_s15  }
  0x91   : > { %p11_p4 = scmp.ge.s32.totalorder %s14_s15, 4  }
  0x93   :  { %13 = sbr.rel (!%p11_p4) target bundleno = 1 (0x1), region = 69 }

</bundles_post_ra>
